<compile_context>
chip_gen: v6e
topology: v6e:2x2x1
jax: 0.10.0
libtpu: 0.0.40
codegen_flags: <defaults>
</compile_context>

<pallas_src>
import jax
import jax.numpy as jnp
from jax.experimental import pallas as pl
from jax.experimental.pallas import tpu as pltpu

_LANES = 128


def _round_up(x, m):
    return ((x + m - 1) // m) * m


def _make_svm_kernel(lane_dense_out):
    """Build the per-tile kernel; `lane_dense_out` selects (1, TM) vs (TM, 1) output blocks."""

    def kernel(x_ref, w_ref, b_ref, o_ref, acc_ref):
        # x_ref: (TM, F) VMEM (streamed / double-buffered per grid step)
        # w_ref: (1, F)  VMEM (same block every step -> resident)
        # b_ref: (1, 1)  SMEM scalar
        # o_ref: (1, TM) or (TM, 1) VMEM
        # acc_ref: (TM, 128) f32 VMEM scratch (partial lane accumulator)
        tm, f = x_ref.shape
        n_full = f // _LANES
        rem = f - n_full * _LANES

        if n_full:
            # VPU multiply-add per 128-lane chunk; defer the cross-lane reduce to one pass/tile.
            acc_ref[...] = jnp.zeros_like(acc_ref)
            for c in range(n_full):  # static unroll; slice offsets are compile-time constants
                sl = slice(c * _LANES, (c + 1) * _LANES)
                acc_ref[...] += (x_ref[:, sl].astype(jnp.float32)
                                 * w_ref[:, sl].astype(jnp.float32))
            row = jnp.sum(acc_ref[...], axis=-1, keepdims=True)        # (TM, 1), single XLU pass
        else:
            row = jnp.zeros((tm, 1), jnp.float32)

        if rem:  # ragged feature tail (F % 128 != 0)
            sl = slice(n_full * _LANES, f)
            row = row + jnp.sum(x_ref[:, sl].astype(jnp.float32)
                                * w_ref[:, sl].astype(jnp.float32),
                                axis=-1, keepdims=True)

        row = row + b_ref[0, 0]

        if lane_dense_out:
            # Lane-dense store: (TM,1)->(1,TM) once per tile so writeback uses full-lane stores.
            o_ref[...] = jnp.reshape(row, (1, tm)).astype(o_ref.dtype)
        else:
            o_ref[...] = row.astype(o_ref.dtype)

    return kernel


def _device_vmem_config():
    """(vmem_limit_bytes or None, VMEM budget for the streamed x tiles + accumulator + temps)."""
    kind = ""
    try:
        kind = jax.devices()[0].device_kind.lower()
    except Exception:
        pass
    if "v7" in kind or "7x" in kind:
        return 48 << 20, 36 << 20      # v7x: 64 MiB physical per TC -> leave headroom
    if "v6" in kind:
        return 64 << 20, 48 << 20      # v6e: conservative limit (review), 128 MiB physical
    if "v5 lite" in kind or "v5e" in kind or "v5litepod" in kind:
        return 64 << 20, 48 << 20      # v5e: 128 MiB physical, default scoped limit is 16 MiB
    # Unknown generation: stay inside the compiler's default scoped limit.
    return None, 12 << 20


def _choose_tile_rows(n, f, itemsize, stream_budget_bytes):
    """Largest row tile whose double-buffered x stream + accumulator fit the VMEM budget."""
    f_pad = _round_up(f, _LANES)                              # physical lane-padded block width
    sub = 8 if itemsize >= 4 else max(8, 32 // itemsize)      # sublane multiple for the dtype
    # Per-row cost: 2 double-buffered x blocks (lane-padded) + (TM,128) f32 accumulator + ~2
    # lane-chunk f32 temporaries.
    bytes_per_row = 2 * f_pad * itemsize + 3 * _LANES * 4
    tm_budget = max(int(stream_budget_bytes) // bytes_per_row, sub)
    tm_cap = max((16 << 20) // (f_pad * itemsize), sub)       # cap each x buffer at ~16 MiB
    tm = min(tm_budget, tm_cap, _round_up(n, _LANES))
    if tm >= n:
        return n                                              # single full-dim tile (always legal)
    if tm >= _LANES:
        return (tm // _LANES) * _LANES
    return max((tm // sub) * sub, sub)


def svm_forward(x, weight, bias, tile_rows=None):
    """Pallas equivalent of SVM.forward (torch.nn.Linear(n_features, 1)).

    x: (N, F) float32 (bf16 accepted; compute is upcast to f32), weight: (1, F), bias: (1,).
    Returns (N, 1) float32.
    """
    N, F = x.shape
    itemsize = jnp.dtype(x.dtype).itemsize
    vmem_limit, stream_budget = _device_vmem_config()
    tm = int(tile_rows) if tile_rows is not None else _choose_tile_rows(N, F, itemsize,
                                                                        stream_budget)
    tm = max(min(tm, N), 1)                 # never a row block taller than the batch
    num_tiles = pl.cdiv(N, tm)              # ragged edge handled by Pallas (no jnp.pad of x)

    w = weight.astype(jnp.float32)
    bias2d = jnp.asarray(bias, jnp.float32).reshape(1, 1)

    def _run(lane_dense_out):
        if lane_dense_out:
            out_shape = jax.ShapeDtypeStruct((num_tiles, tm), jnp.float32)
            out_spec = pl.BlockSpec((1, tm), lambda i: (i, 0))
        else:
            out_shape = jax.ShapeDtypeStruct((N, 1), jnp.float32)
            out_spec = pl.BlockSpec((tm, 1), lambda i: (i, 0))
        return pl.pallas_call(
            _make_svm_kernel(lane_dense_out),
            out_shape=out_shape,
            grid_spec=pltpu.PrefetchScalarGridSpec(
                num_scalar_prefetch=0,
                grid=(num_tiles,),
                in_specs=[
                    pl.BlockSpec((tm, F), lambda i: (i, 0)),              # x: streamed row tiles
                    pl.BlockSpec((1, F), lambda i: (0, 0)),               # weight: VMEM-resident
                    pl.BlockSpec((1, 1), lambda i: (0, 0),
                                 memory_space=pltpu.SMEM),                # bias scalar
                ],
                out_specs=out_spec,
                scratch_shapes=[pltpu.VMEM((tm, _LANES), jnp.float32)],   # partial accumulator
            ),
            compiler_params=pltpu.CompilerParams(
                dimension_semantics=("parallel",),
                vmem_limit_bytes=vmem_limit,
            ),
            cost_estimate=pl.CostEstimate(
                flops=2 * N * F,
                transcendentals=0,
                bytes_accessed=N * F * itemsize + F * 4 + num_tiles * tm * 4,
            ),
        )(x, w, bias2d)

    try:
        out = _run(lane_dense_out=True)
        return out.reshape(-1)[:N].reshape(N, 1)
    except Exception:
        # Fallback: (TM, 1) output blocks (masked stores) if the (TM,1)->(1,TM) relayout is not
        # supported by this Mosaic toolchain.  Output bytes are ~1/F of total traffic, so this
        # only forfeits the lane-dense-store optimization, never correctness.
        return _run(lane_dense_out=False)


if __name__ == "__main__":
    key = jax.random.PRNGKey(0)
    kx1, kw1, kb1, kx2, kw2, kb2, kx3, kw3, kb3 = jax.random.split(key, 9)

    def init_linear(kw, kb, f):
        # Matches torch.nn.Linear(n_features, 1) shapes and uniform(-1/sqrt(F), 1/sqrt(F)) init.
        bound = 1.0 / jnp.sqrt(jnp.float32(f))
        w = jax.random.uniform(kw, (1, f), jnp.float32, -bound, bound)
        b = jax.random.uniform(kb, (1,), jnp.float32, -bound, bound)
        return w, b

    # 1) Small shapes consistent with the module: batch=8 samples, n_features=32 (F<128 tail path).
    N1, F1 = 8, 32
    x1 = jax.random.normal(kx1, (N1, F1), dtype=jnp.float32)
    w1, b1 = init_linear(kw1, kb1, F1)
    o1 = jax.block_until_ready(svm_forward(x1, w1, b1))
    r1 = x1 @ w1.T + b1
    assert o1.shape == (N1, 1)
    assert jnp.allclose(o1, r1, atol=1e-5, rtol=1e-5)

    # 2) Multi-tile ragged batch with NO padding of x: 1000 rows, 200 features (one full 128-lane
    #    chunk + 72-lane tail), explicit 128-row tiles -> 8 grid steps, ragged last tile.
    N2, F2 = 1000, 200
    x2 = jax.random.normal(kx2, (N2, F2), dtype=jnp.float32)
    w2, b2 = init_linear(kw2, kb2, F2)
    o2 = jax.block_until_ready(svm_forward(x2, w2, b2, tile_rows=128))
    r2 = x2 @ w2.T + b2
    assert o2.shape == (N2, 1)
    assert jnp.allclose(o2, r2, atol=1e-4, rtol=1e-4)

    # 3) Default device-derived tile sizing, batch not a multiple of 8, F a multiple of 128.
    N3, F3 = 300, 128
    x3 = jax.random.normal(kx3, (N3, F3), dtype=jnp.float32)
    w3, b3 = init_linear(kw3, kb3, F3)
    o3 = jax.block_until_ready(svm_forward(x3, w3, b3))
    r3 = x3 @ w3.T + b3
    assert o3.shape == (N3, 1)
    assert jnp.allclose(o3, r3, atol=1e-4, rtol=1e-4)

    print("KERNEL_OK")
</pallas_src>

<mosaic_0001>
module attributes {stable_mosaic.version = 11 : i64} {
  func.func @kernel(%arg0: i32, %arg1: memref<8x32xf32, #tpu.memory_space<vmem>>, %arg2: memref<1x32xf32, #tpu.memory_space<vmem>>, %arg3: memref<1x1xf32, #tpu.memory_space<smem>>, %arg4: memref<1x8xf32, #tpu.memory_space<vmem>>, %arg5: memref<8x128xf32, #tpu.memory_space<vmem>>) attributes {dimension_semantics = [#tpu.dimension_semantics<parallel>], iteration_bounds = array<i64: 1>, scalar_prefetch = 0 : i64, scratch_operands = 1 : i64, tpu.core_type = #tpu.core_type<tc>, window_params = [{transform_indices = @transform_0, window_bounds = array<i64: 8, 32>}, {pipeline_mode = #tpu.pipeline_mode<synchronous>, transform_indices = @transform_1, window_bounds = array<i64: 1, 32>}, {transform_indices = @transform_2, window_bounds = array<i64: 1, 1>}, {transform_indices = @transform_3, window_bounds = array<i64: 1, 8>}]} {
    %cst = arith.constant 0.000000e+00 : f32
    %0 = vector.broadcast %cst : f32 to vector<8x1xf32>
    %c0 = arith.constant 0 : index
    %c0_0 = arith.constant 0 : index
    %1 = vector.load %arg1[%c0, %c0_0] : memref<8x32xf32, #tpu.memory_space<vmem>>, vector<8x32xf32>
    %c0_1 = arith.constant 0 : index
    %c0_2 = arith.constant 0 : index
    %2 = vector.load %arg2[%c0_1, %c0_2] : memref<1x32xf32, #tpu.memory_space<vmem>>, vector<1x32xf32>
    %3 = vector.broadcast %2 : vector<1x32xf32> to vector<8x32xf32>
    %4 = arith.mulf %1, %3 : vector<8x32xf32>
    %cst_3 = arith.constant dense<0.000000e+00> : vector<8xf32>
    %5 = vector.multi_reduction <add>, %4, %cst_3 [1] : vector<8x32xf32> to vector<8xf32>
    %6 = vector.shape_cast %5 : vector<8xf32> to vector<8x1xf32>
    %7 = arith.addf %0, %6 : vector<8x1xf32>
    %c0_4 = arith.constant 0 : index
    %c0_5 = arith.constant 0 : index
    %8 = memref.load %arg3[%c0_4, %c0_5] : memref<1x1xf32, #tpu.memory_space<smem>>
    %9 = vector.broadcast %8 : f32 to vector<8x1xf32>
    %10 = arith.addf %7, %9 : vector<8x1xf32>
    %11 = vector.shape_cast %10 : vector<8x1xf32> to vector<1x8xf32>
    %c0_6 = arith.constant 0 : index
    %c0_7 = arith.constant 0 : index
    %12 = vector.load %arg4[%c0_6, %c0_7] : memref<1x8xf32, #tpu.memory_space<vmem>>, vector<1x8xf32>
    tpu.vector_store %arg4[%c0_6, %c0_7], %11 {strides = array<i32>} : memref<1x8xf32, #tpu.memory_space<vmem>>, vector<1x8xf32>,
    return
  }
  func.func @transform_0(%arg0: i32) -> (i32, i32) {
    %c0_i32 = arith.constant 0 : i32
    %c0_i32_0 = arith.constant 0 : i32
    return %arg0, %c0_i32 : i32, i32
  }
  func.func @transform_1(%arg0: i32) -> (i32, i32) {
    %c0_i32 = arith.constant 0 : i32
    %c0_i32_0 = arith.constant 0 : i32
    %c0_i32_1 = arith.constant 0 : i32
    return %c0_i32, %c0_i32_0 : i32, i32
  }
  func.func @transform_2(%arg0: i32) -> (i32, i32) {
    %c0_i32 = arith.constant 0 : i32
    %c0_i32_0 = arith.constant 0 : i32
    %c0_i32_1 = arith.constant 0 : i32
    return %c0_i32, %c0_i32_0 : i32, i32
  }
  func.func @transform_3(%arg0: i32) -> (i32, i32) {
    %c0_i32 = arith.constant 0 : i32
    %c0_i32_0 = arith.constant 0 : i32
    return %arg0, %c0_i32 : i32, i32
  }
}

module attributes {stable_mosaic.version = 11 : i64} {
  func.func @kernel(%arg0: i32, %arg1: memref<8x32xf32, #tpu.memory_space<vmem>>, %arg2: memref<1x32xf32, #tpu.memory_space<vmem>>, %arg3: memref<1x1xf32, #tpu.memory_space<smem>>, %arg4: memref<8x1xf32, #tpu.memory_space<vmem>>, %arg5: memref<8x128xf32, #tpu.memory_space<vmem>>) attributes {dimension_semantics = [#tpu.dimension_semantics<parallel>], iteration_bounds = array<i64: 1>, scalar_prefetch = 0 : i64, scratch_operands = 1 : i64, tpu.core_type = #tpu.core_type<tc>, window_params = [{transform_indices = @transform_0, window_bounds = array<i64: 8, 32>}, {pipeline_mode = #tpu.pipeline_mode<synchronous>, transform_indices = @transform_1, window_bounds = array<i64: 1, 32>}, {transform_indices = @transform_2, window_bounds = array<i64: 1, 1>}, {transform_indices = @transform_3, window_bounds = array<i64: 8, 1>}]} {
    %cst = arith.constant 0.000000e+00 : f32
    %0 = vector.broadcast %cst : f32 to vector<8x1xf32>
    %c0 = arith.constant 0 : index
    %c0_0 = arith.constant 0 : index
    %1 = vector.load %arg1[%c0, %c0_0] : memref<8x32xf32, #tpu.memory_space<vmem>>, vector<8x32xf32>
    %c0_1 = arith.constant 0 : index
    %c0_2 = arith.constant 0 : index
    %2 = vector.load %arg2[%c0_1, %c0_2] : memref<1x32xf32, #tpu.memory_space<vmem>>, vector<1x32xf32>
    %3 = vector.broadcast %2 : vector<1x32xf32> to vector<8x32xf32>
    %4 = arith.mulf %1, %3 : vector<8x32xf32>
    %cst_3 = arith.constant dense<0.000000e+00> : vector<8xf32>
    %5 = vector.multi_reduction <add>, %4, %cst_3 [1] : vector<8x32xf32> to vector<8xf32>
    %6 = vector.shape_cast %5 : vector<8xf32> to vector<8x1xf32>
    %7 = arith.addf %0, %6 : vector<8x1xf32>
    %c0_4 = arith.constant 0 : index
    %c0_5 = arith.constant 0 : index
    %8 = memref.load %arg3[%c0_4, %c0_5] : memref<1x1xf32, #tpu.memory_space<smem>>
    %9 = vector.broadcast %8 : f32 to vector<8x1xf32>
    %10 = arith.addf %7, %9 : vector<8x1xf32>
    %c0_6 = arith.constant 0 : index
    %c0_7 = arith.constant 0 : index
    %11 = vector.load %arg4[%c0_6, %c0_7] : memref<8x1xf32, #tpu.memory_space<vmem>>, vector<8x1xf32>
    tpu.vector_store %arg4[%c0_6, %c0_7], %10 {strides = array<i32>} : memref<8x1xf32, #tpu.memory_space<vmem>>, vector<8x1xf32>,
    return
  }
  func.func @transform_0(%arg0: i32) -> (i32, i32) {
    %c0_i32 = arith.constant 0 : i32
    %c0_i32_0 = arith.constant 0 : i32
    return %arg0, %c0_i32 : i32, i32
  }
  func.func @transform_1(%arg0: i32) -> (i32, i32) {
    %c0_i32 = arith.constant 0 : i32
    %c0_i32_0 = arith.constant 0 : i32
    %c0_i32_1 = arith.constant 0 : i32
    return %c0_i32, %c0_i32_0 : i32, i32
  }
  func.func @transform_2(%arg0: i32) -> (i32, i32) {
    %c0_i32 = arith.constant 0 : i32
    %c0_i32_0 = arith.constant 0 : i32
    %c0_i32_1 = arith.constant 0 : i32
    return %c0_i32, %c0_i32_0 : i32, i32
  }
  func.func @transform_3(%arg0: i32) -> (i32, i32) {
    %c0_i32 = arith.constant 0 : i32
    %c0_i32_0 = arith.constant 0 : i32
    return %arg0, %c0_i32 : i32, i32
  }
}

</mosaic_0001>

<bundles_post_ra>
// kernel: tpu_custom_call.1
= control target key start
LH: loop header
LB: loop body
LE: loop exit
PB: predicated region body
PF: predicated region fallthrough
CT: control target
= control target key end

     0   :  { %9 = vsyncpa [#allocation5], 0  ;;  %s151_s0 = inlined_call_operand.hbm [shape: f32[8,32], index: 0, kind: input, shape index: {}]   ;;  %s152_s1 = inlined_call_operand.vmem [shape: f32[1,32], index: 1, kind: input, shape index: {}]   ;;  %s153_s2 = inlined_call_operand.<no memory space> [shape: f32[1,1], index: 2, kind: input, shape index: {}]   ;;  %s154_s3 = inlined_call_operand.hbm [shape: f32[1,8], index: 3, kind: output, shape index: {}]  }
   0x1   :  { %10 = vsyncpa [#allocation6], 0  ;;  %s117_s12 = smov [#allocation4]  }
   0x2   :  { %s17_s13 = sshll.u32 %s117_s12, 4  ;;  %s18_s13 = int_to_ptr.vmem [resolvable:$true] %s17_s13 }
   0x3   :  { %s81_s14 = scalar_lea.vmem %s18_s13, 128  ;;  %p86_p1 = scmp.lt.s32.totalorder %s18_s13, %s18_s13 }
   0x4   :  { %p82_p0 = scmp.ne.s32.totalorder %s18_s13, %s81_s14  ;;  %p87_p2 = scmp.lt.s32.totalorder %s81_s14, %s81_s14 }
   0x6   :  { %p88_p3 = por %p87_p2, %p86_p1 }
   0x8   :  { %p89_p4 = pnand %p88_p3, %p82_p0 }
   0xa   :  { %92 = shalt.err (!%p89_p4)
}
   0xb   :  { %20 = dma.hbm_to_vmem [thread:$0]  %s151_s0, 128, %s18_s13, [#allocation5]  }
   0xc   :  { %113 = dma.done.wait [#allocation5], 128  }
   0xd   :  { %114 = vsyncadd [#allocation5], 4294967168  ;;  %v28_v0 = vld [vmem:[#allocation4] sm:$0xff]  ;;  %vm37_vm0 = vcmask 261120   ;;  %v46_v4 = vlaneseq  ;;  %v43_v7 = vstv %s153_s2  ;;  %s118_s0 = smov [#allocation7]   ;;  %vm53_vm1 = vcmask 57344  }
   0xe   :  { %v70_v1 = vld [vmem:[%s152_s1] ss:$0 sm:$0xff]  ;;  %s61_s21 = sshll.u32 %s118_s0, 4  ;;  %s62_s21 = int_to_ptr.vmem [resolvable:$true] %s61_s21 }
   0xf   :  { %v36_v2 = vmul.f32 %v70_v1, %v28_v0  ;;  %v47_v5 = vand.u32 127, %v46_v4  ;;  %v49_v6 = vshrl.u32 %v46_v4, 7  ;;  %s93_s1 = scalar_lea.vmem %s62_s21, 16  ;;  %s97_s22 = scalar_lea.vmem %s62_s21, 32 }
  0x10   :  { %p94_p5 = scmp.ne.s32.totalorder %s62_s21, %s93_s1  ;;  %p98_p6 = scmp.lt.s32.totalorder %s62_s21, %s62_s21 }
  0x11   :  { %v38_v3 = vsel %vm37_vm0, %v36_v2, 0.0  ;;  %v50_v8 = vsub.s32 %v47_v5, %v49_v6  ;;  %p99_p7 = scmp.lt.s32.totalorder %s97_s22, %s93_s1 }
  0x12   :  { %39 = vadd.xlane.f32.xlu0 %v38_v3 }
  0x13   :  { %p100_p8 = por %p99_p7, %p98_p6 }
  0x15   :  { %p101_p9 = pnand %p100_p8, %p94_p5 }
  0x9b   :  { %v40_v9 = vpop.xlane.xlu0 %39 }
  0x9c   :  { %v44_v10 = vadd.f32 %v43_v7, %v40_v9 }
  0x9e   :  { %v51_v11 = vrot.slane %v44_v10, %v50_v8 }
  0xa0   :  { %54 = vst.msk [vmem:[#allocation7] sm:$0x1] %vm53_vm1, %v51_v11 }
  0xa1   :  { %104 = shalt.err (!%p101_p9)
}
  0xa2   :  { %64 = dma.vmem_to_hbm [thread:$0]  %s62_s21, 16, %s154_s3, [#allocation6]  }
  0xa3   :  { %115 = dma.done.wait [#allocation6], 16  }
  0xa4   :  { %116 = vsyncadd [#allocation6], 4294967280 }
  0xa5   :  { %68 = vsyncpa [#allocation5], 1 }
  0xa6   :  { %69 = vsyncpa [#allocation6], 1 }

// kernel: tpu_custom_call.1
= control target key start
LH: loop header
LB: loop body
LE: loop exit
PB: predicated region body
PF: predicated region fallthrough
CT: control target
= control target key end

     0   :  { %9 = vsyncpa [#allocation5], 0  ;;  %s75_s12 = smov [#allocation4]   ;;  %s108_s0 = inlined_call_operand.hbm [shape: f32[8,32], index: 0, kind: input, shape index: {}]   ;;  %s109_s1 = inlined_call_operand.vmem [shape: f32[1,32], index: 1, kind: input, shape index: {}]   ;;  %s110_s2 = inlined_call_operand.<no memory space> [shape: f32[1,1], index: 2, kind: input, shape index: {}]   ;;  %s111_s3 = inlined_call_operand.vmem [shape: f32[8,1], index: 3, kind: output, shape index: {}]  }
   0x1   :  { %s16_s13 = sshll.u32 %s75_s12, 4  ;;  %s17_s13 = int_to_ptr.vmem [resolvable:$true] %s16_s13 }
   0x2   :  { %s61_s14 = scalar_lea.vmem %s17_s13, 128  ;;  %p66_p1 = scmp.lt.s32.totalorder %s17_s13, %s17_s13 }
   0x3   :  { %p62_p0 = scmp.ne.s32.totalorder %s17_s13, %s61_s14  ;;  %p67_p2 = scmp.lt.s32.totalorder %s61_s14, %s61_s14 }
   0x5   :  { %p68_p3 = por %p67_p2, %p66_p1 }
   0x7   :  { %p69_p4 = pnand %p68_p3, %p62_p0 }
   0x9   :  { %72 = shalt.err (!%p69_p4)
}
   0xa   :  { %19 = dma.hbm_to_vmem [thread:$0]  %s108_s0, 128, %s17_s13, [#allocation5]  }
   0xb   :  { %73 = dma.done.wait [#allocation5], 128  }
   0xc   :  { %74 = vsyncadd [#allocation5], 4294967168  ;;  %v27_v0 = vld [vmem:[#allocation4] sm:$0xff]  ;;  %vm36_vm0 = vcmask 261120   ;;  %v42_v4 = vstv %s110_s2  ;;  %vm44_vm1 = vcmask 7168  }
   0xd   :  { %v51_v1 = vld [vmem:[%s109_s1] ss:$0 sm:$0xff] }
   0xe   :  { %v35_v2 = vmul.f32 %v51_v1, %v27_v0 }
  0x10   :  { %v37_v3 = vsel %vm36_vm0, %v35_v2, 0.0 }
  0x11   :  { %38 = vadd.xlane.f32.xlu0 %v37_v3 }
  0x9a   :  { %v39_v5 = vpop.xlane.xlu0 %38 }
  0x9b   :  { %v43_v6 = vadd.f32 %v42_v4, %v39_v5 }
  0x9d   :  { %45 = vst.msk [vmem:[%s111_s3] sm:$0xff] %vm44_vm1, %v43_v6 }
  0x9e   :  { %50 = vsyncpa [#allocation5], 1 }

</bundles_post_ra>
